<compile_context>
chip_gen: v7x
topology: tpu7x:2x2x1
jax: 0.10.0
libtpu: 0.0.40
codegen_flags: <defaults>
</compile_context>

<pallas_src>
import functools

import jax
import jax.numpy as jnp
from jax.experimental import pallas as pl
from jax.experimental.pallas import tpu as pltpu


def _euclidean_loss_kernel(x_ref, y_ref, sel_ref, o_ref, acc_ref, *,
                           valid_rows, tiles_per_part, block_rows):
    p = pl.program_id(0)
    t = pl.program_id(1)

    # Reset the per-partition vector accumulator at the start of its tile loop.
    @pl.when(t == 0)
    def _init():
        acc_ref[...] = jnp.zeros_like(acc_ref)

    x = x_ref[...].astype(jnp.float32)          # (R, L)
    y = y_ref[...].astype(jnp.float32)
    d = x - y                                    # abs dropped: d*d == |d|*|d|
    dsq = d * d

    # Segmented lane reduction on the MXU: sel is a (L, G) 0/1 block-diagonal
    # selector (sel[l, g] = 1 iff lane l belongs to original row-group g).
    # hi/lo bf16 split keeps the result f32-accurate regardless of how the
    # MXU handles f32 operands: hi is bf16-representable (exact), lo carries
    # the residual (error ~2^-18 relative).
    sel = sel_ref[...]                           # (L, G) bf16 of {0, 1}
    hi = dsq.astype(jnp.bfloat16)
    lo = (dsq - hi.astype(jnp.float32)).astype(jnp.bfloat16)
    sumsq = (jnp.dot(hi, sel, preferred_element_type=jnp.float32)
             + jnp.dot(lo, sel, preferred_element_type=jnp.float32))   # (R, G)
    norms = jnp.sqrt(sumsq)                      # (R, G) per-original-row norms

    # Mask rows coming from tile padding / clamped out-of-range tiles.
    base = (p * tiles_per_part + t) * block_rows
    row = base + jax.lax.broadcasted_iota(jnp.int32, norms.shape, 0)
    norms = jnp.where(row < valid_rows, norms, 0.0)

    # Vector accumulate (pure VPU); no per-step cross-lane reduce.
    acc_ref[...] += norms

    # Single cross-lane reduce + partial-sum writeback at the end of the loop.
    @pl.when(t == tiles_per_part - 1)
    def _finalize():
        col = jnp.sum(acc_ref[...], axis=0, keepdims=True)   # (1, G)
        tot = jnp.sum(col, axis=1, keepdims=True)            # (1, 1)
        o_ref[...] = tot.reshape(1, 1, 1)


def euclidean_distance_loss(x, y, *, target_tile_bytes=1 << 20):
    """x, y: (B, S, D) arrays. Returns scalar float32 loss (mean L2 over dim 2)."""
    assert x.shape == y.shape and x.ndim == 3, "expected (B, S, D) inputs"
    B, S, D = x.shape
    N = B * S

    xf = x.reshape(N, D).astype(jnp.float32)
    yf = y.reshape(N, D).astype(jnp.float32)

    # Lane-dense repack: fold G = 128 // D consecutive rows into one 128-lane
    # row so the minor dim is a full vreg / DMA lane width.
    if 128 % D == 0 and (N * D) % 128 == 0:
        lanes = 128
        groups = 128 // D
        rows = (N * D) // 128
        xr = xf.reshape(rows, lanes)
        yr = yf.reshape(rows, lanes)
    else:
        # TODO(synk): D that neither divides nor is a multiple of 128 stays
        # lane-padded (correct, just not bandwidth-optimal).
        lanes = D
        groups = 1
        rows = N
        xr, yr = xf, yf

    # 0/1 block-diagonal selector: sel[l, g] = 1 iff lane l // D == g.
    sel = (jnp.arange(lanes, dtype=jnp.int32)[:, None] // D
           == jnp.arange(groups, dtype=jnp.int32)[None, :]).astype(jnp.bfloat16)

    # Pad tiny row counts up to the 8-sublane granule (cheap: only when rows < 8).
    valid_rows = rows
    if rows < 8:
        xr = jnp.pad(xr, ((0, 8 - rows), (0, 0)))
        yr = jnp.pad(yr, ((0, 8 - rows), (0, 0)))
        rows = 8

    # Row tile: ~1 MiB per input tile; 2 inputs x 2 pipeline buffers + scratch
    # stays well under the default scoped VMEM limit on v5e/v6e/v7x.
    target_rows = max(8, (target_tile_bytes // (4 * lanes)) // 8 * 8)
    block_rows = min(target_rows, (rows // 8) * 8)
    num_tiles = -(-rows // block_rows)
    num_parts = 2 if num_tiles >= 2 else 1        # use both TensorCores on v7x
    tiles_per_part = -(-num_tiles // num_parts)

    def row_map(p, t):
        # Clamp so the (possibly) out-of-range last tile of the last partition
        # re-reads valid data; its contribution is masked to zero in-kernel.
        return (jnp.minimum(p * tiles_per_part + t, num_tiles - 1), 0)

    kernel = functools.partial(
        _euclidean_loss_kernel,
        valid_rows=valid_rows,
        tiles_per_part=tiles_per_part,
        block_rows=block_rows,
    )

    partial_sums = pl.pallas_call(
        kernel,
        out_shape=jax.ShapeDtypeStruct((num_parts, 1, 1), jnp.float32),
        grid_spec=pltpu.PrefetchScalarGridSpec(
            num_scalar_prefetch=0,
            grid=(num_parts, tiles_per_part),
            in_specs=[
                pl.BlockSpec((block_rows, lanes), row_map),
                pl.BlockSpec((block_rows, lanes), row_map),
                pl.BlockSpec((lanes, groups), lambda p, t: (0, 0)),
            ],
            out_specs=pl.BlockSpec((1, 1, 1), lambda p, t: (p, 0, 0)),
            scratch_shapes=[pltpu.VMEM((block_rows, groups), jnp.float32)],
        ),
        compiler_params=pltpu.CompilerParams(
            dimension_semantics=("parallel", "arbitrary"),
        ),
        cost_estimate=pl.CostEstimate(
            flops=3 * N * D,
            transcendentals=N,
            bytes_accessed=2 * N * D * 4,
        ),
    )(xr, yr, sel)

    return jnp.sum(partial_sums) / jnp.float32(N)


if __name__ == "__main__":
    key = jax.random.PRNGKey(0)
    k1, k2 = jax.random.split(key)
    B, S, D = 2, 8, 32
    x = jax.random.normal(k1, (B, S, D), dtype=jnp.float32)
    y = jax.random.normal(k2, (B, S, D), dtype=jnp.float32)

    loss = jax.jit(euclidean_distance_loss)(x, y)
    jax.block_until_ready(loss)

    # Pure-JAX reference (same math as the PyTorch module).
    ref = jnp.mean(jnp.sqrt(jnp.sum(jnp.abs(x - y) ** 2, axis=2)))
    assert jnp.allclose(loss, ref, rtol=1e-5, atol=1e-4), (loss, ref)

    print("KERNEL_OK")
</pallas_src>

<mosaic_0001>
module attributes {stable_mosaic.version = 11 : i64} {
  func.func @_euclidean_loss_kernel(%arg0: i32, %arg1: i32, %arg2: memref<8x128xf32, #tpu.memory_space<vmem>>, %arg3: memref<8x128xf32, #tpu.memory_space<vmem>>, %arg4: memref<128x4xbf16, #tpu.memory_space<vmem>>, %arg5: memref<1x1x1xf32, #tpu.memory_space<vmem>>, %arg6: memref<8x4xf32, #tpu.memory_space<vmem>>) attributes {dimension_semantics = [#tpu.dimension_semantics<parallel>, #tpu.dimension_semantics<arbitrary>], iteration_bounds = array<i64: 1, 1>, scalar_prefetch = 0 : i64, scratch_operands = 1 : i64, tpu.core_type = #tpu.core_type<tc>, window_params = [{transform_indices = @transform_0, window_bounds = array<i64: 8, 128>}, {transform_indices = @transform_1, window_bounds = array<i64: 8, 128>}, {pipeline_mode = #tpu.pipeline_mode<synchronous>, transform_indices = @transform_2, window_bounds = array<i64: 128, 4>}, {transform_indices = @transform_3, window_bounds = array<i64: 1, 1, 1>}]} {
    %c0_i32 = arith.constant 0 : i32
    %0 = arith.cmpi eq, %arg1, %c0_i32 : i32
    %1 = arith.extui %0 : i1 to i32
    %c0_i32_0 = arith.constant 0 : i32
    %2 = arith.cmpi ne, %1, %c0_i32_0 : i32
    scf.if %2 {
      %cst_14 = arith.constant 0.000000e+00 : f32
      %32 = vector.broadcast %cst_14 : f32 to vector<8x4xf32>
      %c0_15 = arith.constant 0 : index
      %c0_16 = arith.constant 0 : index
      %33 = vector.load %arg6[%c0_15, %c0_16] : memref<8x4xf32, #tpu.memory_space<vmem>>, vector<8x4xf32>
      tpu.vector_store %arg6[%c0_15, %c0_16], %32 {strides = array<i32>} : memref<8x4xf32, #tpu.memory_space<vmem>>, vector<8x4xf32>,
    } else {
    }
    %c0 = arith.constant 0 : index
    %c0_1 = arith.constant 0 : index
    %3 = vector.load %arg2[%c0, %c0_1] : memref<8x128xf32, #tpu.memory_space<vmem>>, vector<8x128xf32>
    %c0_2 = arith.constant 0 : index
    %c0_3 = arith.constant 0 : index
    %4 = vector.load %arg3[%c0_2, %c0_3] : memref<8x128xf32, #tpu.memory_space<vmem>>, vector<8x128xf32>
    %5 = arith.subf %3, %4 : vector<8x128xf32>
    %6 = arith.mulf %5, %5 : vector<8x128xf32>
    %c0_4 = arith.constant 0 : index
    %c0_5 = arith.constant 0 : index
    %7 = vector.load %arg4[%c0_4, %c0_5] : memref<128x4xbf16, #tpu.memory_space<vmem>>, vector<128x4xbf16>
    %8 = arith.truncf %6 : vector<8x128xf32> to vector<8x128xbf16>
    %9 = arith.extf %8 : vector<8x128xbf16> to vector<8x128xf32>
    %10 = arith.subf %6, %9 : vector<8x128xf32>
    %11 = arith.truncf %10 : vector<8x128xf32> to vector<8x128xbf16>
    %cst = arith.constant dense<0.000000e+00> : vector<8x4xf32>
    %12 = tpu.matmul %8, %7, %cst {dimension_numbers = #tpu.dot_dimension_numbers<[1], [0], [0], [1], [0, 0, 1, 1], [], []>} : vector<8x128xbf16>, vector<128x4xbf16>, vector<8x4xf32> -> vector<8x4xf32>
    %cst_6 = arith.constant dense<0.000000e+00> : vector<8x4xf32>
    %13 = tpu.matmul %11, %7, %cst_6 {dimension_numbers = #tpu.dot_dimension_numbers<[1], [0], [0], [1], [0, 0, 1, 1], [], []>} : vector<8x128xbf16>, vector<128x4xbf16>, vector<8x4xf32> -> vector<8x4xf32>
    %14 = arith.addf %12, %13 : vector<8x4xf32>
    %15 = math.sqrt %14 : vector<8x4xf32>
    %c1_i32 = arith.constant 1 : i32
    %16 = arith.muli %arg0, %c1_i32 : i32
    %17 = arith.addi %16, %arg1 : i32
    %c8_i32 = arith.constant 8 : i32
    %18 = arith.muli %17, %c8_i32 : i32
    %19 = tpu.iota {dimensions = array<i32: 0>} : vector<8x4xi32>
    %20 = vector.broadcast %18 : i32 to vector<8x4xi32>
    %21 = arith.addi %20, %19 : vector<8x4xi32>
    %c4_i32 = arith.constant 4 : i32
    %22 = vector.broadcast %c4_i32 : i32 to vector<8x4xi32>
    %23 = arith.cmpi slt, %21, %22 : vector<8x4xi32>
    %cst_7 = arith.constant 0.000000e+00 : f32
    %24 = vector.broadcast %cst_7 : f32 to vector<8x4xf32>
    %25 = arith.select %23, %15, %24 : vector<8x4xi1>, vector<8x4xf32>
    %c0_8 = arith.constant 0 : index
    %c0_9 = arith.constant 0 : index
    %26 = vector.load %arg6[%c0_8, %c0_9] : memref<8x4xf32, #tpu.memory_space<vmem>>, vector<8x4xf32>
    %27 = arith.addf %26, %25 : vector<8x4xf32>
    %c0_10 = arith.constant 0 : index
    %c0_11 = arith.constant 0 : index
    %28 = vector.load %arg6[%c0_10, %c0_11] : memref<8x4xf32, #tpu.memory_space<vmem>>, vector<8x4xf32>
    tpu.vector_store %arg6[%c0_10, %c0_11], %27 {strides = array<i32>} : memref<8x4xf32, #tpu.memory_space<vmem>>, vector<8x4xf32>,
    %c0_i32_12 = arith.constant 0 : i32
    %29 = arith.cmpi eq, %arg1, %c0_i32_12 : i32
    %30 = arith.extui %29 : i1 to i32
    %c0_i32_13 = arith.constant 0 : i32
    %31 = arith.cmpi ne, %30, %c0_i32_13 : i32
    scf.if %31 {
      %c0_14 = arith.constant 0 : index
      %c0_15 = arith.constant 0 : index
      %32 = vector.load %arg6[%c0_14, %c0_15] : memref<8x4xf32, #tpu.memory_space<vmem>>, vector<8x4xf32>
      %cst_16 = arith.constant dense<0.000000e+00> : vector<4xf32>
      %33 = vector.multi_reduction <add>, %32, %cst_16 [0] : vector<8x4xf32> to vector<4xf32>
      %34 = vector.shape_cast %33 : vector<4xf32> to vector<1x4xf32>
      %cst_17 = arith.constant dense<0.000000e+00> : vector<1xf32>
      %35 = vector.multi_reduction <add>, %34, %cst_17 [1] : vector<1x4xf32> to vector<1xf32>
      %36 = vector.shape_cast %35 : vector<1xf32> to vector<1x1xf32>
      %37 = vector.shape_cast %36 : vector<1x1xf32> to vector<1x1x1xf32>
      %c0_18 = arith.constant 0 : index
      %c0_19 = arith.constant 0 : index
      %c0_20 = arith.constant 0 : index
      %38 = vector.load %arg5[%c0_18, %c0_19, %c0_20] : memref<1x1x1xf32, #tpu.memory_space<vmem>>, vector<1x1x1xf32>
      tpu.vector_store %arg5[%c0_18, %c0_19, %c0_20], %37 {strides = array<i32>} : memref<1x1x1xf32, #tpu.memory_space<vmem>>, vector<1x1x1xf32>,
    } else {
    }
    return
  }
  func.func @transform_0(%arg0: i32, %arg1: i32) -> (i32, i32) {
    %c1_i32 = arith.constant 1 : i32
    %0 = arith.muli %arg0, %c1_i32 : i32
    %1 = arith.addi %0, %arg1 : i32
    %c0_i32 = arith.constant 0 : i32
    %2 = arith.minsi %1, %c0_i32 : i32
    %c0_i32_0 = arith.constant 0 : i32
    %c0_i32_1 = arith.constant 0 : i32
    return %2, %c0_i32_0 : i32, i32
  }
  func.func @transform_1(%arg0: i32, %arg1: i32) -> (i32, i32) {
    %c1_i32 = arith.constant 1 : i32
    %0 = arith.muli %arg0, %c1_i32 : i32
    %1 = arith.addi %0, %arg1 : i32
    %c0_i32 = arith.constant 0 : i32
    %2 = arith.minsi %1, %c0_i32 : i32
    %c0_i32_0 = arith.constant 0 : i32
    %c0_i32_1 = arith.constant 0 : i32
    return %2, %c0_i32_0 : i32, i32
  }
  func.func @transform_2(%arg0: i32, %arg1: i32) -> (i32, i32) {
    %c0_i32 = arith.constant 0 : i32
    %c0_i32_0 = arith.constant 0 : i32
    %c0_i32_1 = arith.constant 0 : i32
    return %c0_i32, %c0_i32_0 : i32, i32
  }
  func.func @transform_3(%arg0: i32, %arg1: i32) -> (i32, i32, i32) {
    %c0_i32 = arith.constant 0 : i32
    %c0_i32_0 = arith.constant 0 : i32
    %c0_i32_1 = arith.constant 0 : i32
    return %arg0, %c0_i32, %c0_i32_0 : i32, i32, i32
  }
}

</mosaic_0001>

<bundles_post_ra>
// kernel: euclidean_distance_loss.1
= control target key start
LH: loop header
LB: loop body
LE: loop exit
PB: predicated region body
PF: predicated region fallthrough
CT: control target
= control target key end

     0   :  { %v393_v1 = vmov 0.0   ;;  %vm394_vm0 = vmmov 0   ;;  %s462_s0 = inlined_call_operand.vmem [shape: f32[8,128], index: 0, kind: input, shape index: {}]   ;;  %s463_s1 = inlined_call_operand.vmem [shape: f32[8,128], index: 1, kind: input, shape index: {}]   ;;  %s464_s2 = inlined_call_operand.vmem [shape: bf16[128,4], index: 2, kind: input, shape index: {}]   ;;  %s465_s3 = inlined_call_operand.hbm [shape: f32[1,1,1], index: 3, kind: output, shape index: {}]  }
   0x1   :  { %v359_v0 = vld [vmem:[%s464_s2] sm:$0xff]   ;;  %315 = vmatprep.subr.bf16.mxu1 %v393_v1  ;;  %335 = vmatprep.subr.bf16.mxu0 %v393_v1  ;;  %v360_v2 = vld [vmem:[%s464_s2 + $0x8] sm:$0xff]   ;;  %v361_v3 = vld [vmem:[%s464_s2 + $0x10] sm:$0xff]  }
   0x2   :  { %316 = vmatpush3.bf16.msra.mxu1 %v359_v0  ;;  %336 = vmatpush3.bf16.msra.mxu0 %v359_v0  ;;  %v76_v4 = vld [vmem:[%s462_s0] sm:$0xff] }
   0x3   :  { %317 = vmatprep.subr.bf16.mxu1 %v393_v1  ;;  %337 = vmatprep.subr.bf16.mxu0 %v393_v1  ;;  %v77_v5 = vld [vmem:[%s463_s1] sm:$0xff] }
   0x4   :  { %331 = vmatprep.mubr.msk.bf16.mxu1 %vm394_vm0, %v393_v1  ;;  %351 = vmatprep.mubr.msk.bf16.mxu0 %vm394_vm0, %v393_v1 }
   0x6   :  { %318 = vmatpush3.bf16.msra.mxu1 %v360_v2  ;;  %338 = vmatpush3.bf16.msra.mxu0 %v360_v2 }
   0x7   :  { %319 = vmatprep.subr.bf16.mxu1 %v393_v1  ;;  %339 = vmatprep.subr.bf16.mxu0 %v393_v1 }
   0x8   :  { %8 = vsyncpa [#allocation4], 0  ;;  %v78_v6 = vsub.f32 %v76_v4, %v77_v5  ;;  %v362_v7 = vld [vmem:[%s464_s2 + $0x18] sm:$0xff]   ;;  %v363_v9 = vld [vmem:[%s464_s2 + $0x20] sm:$0xff]   ;;  %vm74_vm1 = vcmask 31744   ;;  %v237_v26 = vlaneseq  ;;  %vm261_vm5 = vcmask 0  }
   0x9   :  { %v364_v11 = vld [vmem:[%s464_s2 + $0x28] sm:$0xff]   ;;  %v365_v13 = vld [vmem:[%s464_s2 + $0x30] sm:$0xff]   ;;  %v366_v15 = vld [vmem:[%s464_s2 + $0x38] sm:$0xff]   ;;  %75 = vst.msk [vmem:[#allocation2] sm:$0xff] %vm74_vm1, %v393_v1  ;;  %s395_s2 = smov [#allocation3]  }
   0xa   :  { %320 = vmatpush3.bf16.msra.mxu1 %v361_v3  ;;  %340 = vmatpush3.bf16.msra.mxu0 %v361_v3  ;;  %v79_v8 = vmul.f32 %v78_v6, %v78_v6  ;;  %v238_v27 = vshrl.u32 %v237_v26, 7  ;;  %s269_s30 = sshll.u32 %s395_s2, 4  ;;  %s270_s30 = int_to_ptr.vmem [resolvable:$true] %s269_s30 }
   0xb   :  { %321 = vmatprep.subr.bf16.mxu1 %v393_v1  ;;  %341 = vmatprep.subr.bf16.mxu0 %v393_v1  ;;  %s369_s4 = scalar_lea.vmem %s270_s30, 16  ;;  %s373_s5 = scalar_lea.vmem %s270_s30, 32 }
   0xc   :  { %v96_v10 = vpack.c.bf16 %v79_v8, %v79_v8  ;;  %vm241_vm3 = vcmp.lt.s32.totalorder %v238_v27, 4  ;;  %p370_p0 = scmp.ne.s32.totalorder %s270_s30, %s369_s4  ;;  %p374_p1 = scmp.lt.s32.totalorder %s270_s30, %s270_s30 }
   0xd   :  { %p375_p2 = scmp.lt.s32.totalorder %s373_s5, %s369_s4 }
   0xe   :  { %322 = vmatpush3.bf16.msra.mxu1 %v362_v7  ;;  %342 = vmatpush3.bf16.msra.mxu0 %v362_v7  ;;  %v97_v12 = vunpack.c.l.bf16 %v96_v10 }
   0xf   :  { %323 = vmatprep.subr.bf16.mxu1 %v393_v1  ;;  %343 = vmatprep.subr.bf16.mxu0 %v393_v1  ;;  %p376_p3 = por %p375_p2, %p374_p1 }
  0x10   :  { %v98_v14 = vsub.f32 %v79_v8, %v97_v12  ;;  %v243_v32 = vld [vmem:[#allocation2] sm:$0xff] }
  0x11   :  { %p377_p4 = pnand %p376_p3, %p370_p0 }
  0x12   :  { %324 = vmatpush3.bf16.msra.mxu1 %v363_v9  ;;  %344 = vmatpush3.bf16.msra.mxu0 %v363_v9  ;;  %v99_v16 = vpack.c.bf16 %v98_v14, %v98_v14 }
  0x13   :  { %325 = vmatprep.subr.bf16.mxu1 %v393_v1  ;;  %345 = vmatprep.subr.bf16.mxu0 %v393_v1 }
  0x16   :  { %326 = vmatpush3.bf16.msra.mxu1 %v364_v11  ;;  %346 = vmatpush3.bf16.msra.mxu0 %v364_v11 }
  0x17   :  { %327 = vmatprep.subr.bf16.mxu1 %v393_v1  ;;  %347 = vmatprep.subr.bf16.mxu0 %v393_v1 }
  0x1a   :  { %328 = vmatpush3.bf16.msra.mxu1 %v365_v13  ;;  %348 = vmatpush3.bf16.msra.mxu0 %v365_v13 }
  0x1b   :  { %329 = vmatprep.subr.bf16.mxu1 %v393_v1  ;;  %349 = vmatprep.subr.bf16.mxu0 %v393_v1 }
  0x1e   :  { %330 = vmatpush3.bf16.msra.mxu1 %v366_v15  ;;  %350 = vmatpush3.bf16.msra.mxu0 %v366_v15 }
  0x21   :  { %332 = vmatmul.mubr.bf16.vlgmr.msra.gmra.mrb[0].mxu1 %v99_v16  ;;  %352 = vmatmul.mubr.bf16.vlgmr.msra.gmra.mrb[0].mxu0 %v96_v10 }
  0xf4   :  { %v182_v17 = vpop.f32.mrb[0].mxu1  ;;  %v222_v18 = vpop.f32.mrb[0].mxu0 }
  0xf5   :  { %v223_v19 = vadd.f32 %v222_v18, %v182_v17  ;;  %v333_v20 = vpop.f32.mrb[1].mxu1  ;;  %v353_v21 = vpop.f32.mrb[1].mxu0 }
  0xf6   :  { %v185_v22 = vpop.f32.mrb[2].mxu1  ;;  %v225_v23 = vpop.f32.mrb[2].mxu0 }
  0xf7   :  { %367 = vrsqrt.f32 %v223_v19  ;;  %v334_v24 = vpop.f32.mrb[3].mxu1  ;;  %v354_v25 = vpop.f32.mrb[3].mxu0  ;;  %vm230_vm2 = vcmp.eq.f32.partialorder %v223_v19, inf  ;;  %v233_v30 = vand.u32 2147483648, %v223_v19  ;;  %vm232_vm4 = vcmp.eq.f32.partialorder %v223_v19, 0.0 }
 0x101   :  { %v368_v28 = vpop.eup %367 }
 0x102   :  { %v229_v29 = vmul.f32 %v368_v28, %v223_v19 }
 0x104   :  { %v231_v31 = vsel %vm230_vm2, %v223_v19, %v229_v29 }
 0x105   :  { %v234_v33 = vsel %vm232_vm4, %v233_v30, %v231_v31 }
 0x106   :  { %v242_v34 = vsel %vm241_vm3, %v234_v33, 0.0 }
 0x107   :  { %v244_v35 = vadd.f32 %v243_v32, %v242_v34 }
 0x109   :  { %246 = vst.msk [vmem:[#allocation2] sm:$0xff] %vm74_vm1, %v244_v35 }
 0x110   :  { %v250_v36 = vld [vmem:[#allocation2] sm:$0xff] }
 0x111   :  { %v251_v37 = vsel %vm74_vm1, %v250_v36, 0.0 }
 0x112   :  { %v252_v38 = vrot.slane %v251_v37, 4 }
 0x114   :  { %v253_v39 = vadd.f32 %v252_v38, %v251_v37 }
 0x116   :  { %v254_v40 = vrot.slane %v253_v39, 2 }
 0x118   :  { %v255_v41 = vadd.f32 %v254_v40, %v253_v39 }
 0x11a   :  { %v256_v42 = vrot.slane %v255_v41, 1 }
 0x11c   :  { %v257_v43 = vadd.f32 %v256_v42, %v255_v41 }
 0x11e   :  { %v258_v44 = vsel %vm74_vm1, %v257_v43, 0.0 }
 0x11f   :  { %259 = vadd.xlane.f32.xlu0 %v258_v44 }
 0x1ac   :  { %v260_v45 = vpop.xlane.xlu0 %259 }
 0x1ad   :  { %262 = vst.msk [vmem:[#allocation3] sm:$0x1] %vm261_vm5, %v260_v45 }
 0x1ae   :  { %380 = shalt.err (!%p377_p4)
}
 0x1af   :  { %s381_s8 = scalar_lea.hbm %s465_s3, 16 }
 0x1b0   :  { %p382_p5 = scmp.ne.s32.totalorder %s465_s3, %s381_s8  ;;  %p385_p6 = scmp.lt.u32.totalorder %s381_s8, %s465_s3 }
 0x1b2   :  { %p387_p7 = pnand %p385_p6, %p382_p5 }
 0x1b4   :  { %390 = shalt.err (!%p387_p7)
}
 0x1b5   :  { %272 = dma.vmem_to_hbm [thread:$0]  %s270_s30, 16, %s465_s3, [#allocation4]  }
 0x1b6   :  { %391 = dma.done.wait [#allocation4], 16  }
 0x1b7   :  { %392 = vsyncadd [#allocation4], 4294967280 }
 0x1b8   :  { %276 = vsyncpa [#allocation4], 1 }

</bundles_post_ra>
